<compile_context>
chip_gen: v7x
topology: tpu7x:2x2x1
jax: 0.10.0
libtpu: 0.0.40
codegen_flags: <defaults>
</compile_context>

<pallas_src>
import functools

import jax
import jax.numpy as jnp
from jax.experimental import pallas as pl
from jax.experimental.pallas import tpu as pltpu

LN_EPS = 1e-5  # torch.nn.LayerNorm default


def _patch_merge_kernel(x_ref, w_ref, b_ref, o_ref):
    """Fused 2x2 merge + LayerNorm(4C) + Linear(4C -> out_pad, affine folded).

    x_ref: (tb, 2, Wo, 2C)  tb output-rows worth of pixel pairs (both H offsets)
    w_ref: (4C, out_pad)    gamma-folded, row-permuted reduction weight
    b_ref: (1, out_pad)     beta @ W  (LayerNorm bias folded through the linear)
    o_ref: (tb*Wo, out_pad)
    """
    tb, _, wo, c2 = x_ref.shape
    x = x_ref[...]
    # Deinterleave the two H offsets (VMEM-local) and concat along channels.
    # Resulting channel order: [x(0,0), x(0,1), x(1,0), x(1,1)]; weight rows
    # were permuted in the wrapper to match.
    top = x[:, 0, :, :]                                    # (tb, Wo, 2C)
    bot = x[:, 1, :, :]                                    # (tb, Wo, 2C)
    xm = jnp.concatenate([top, bot], axis=-1)              # (tb, Wo, 4C)
    xm = xm.reshape(tb * wo, 2 * c2).astype(jnp.float32)   # (rows, 4C)

    # LayerNorm statistics in f32 (biased variance, like torch.nn.LayerNorm).
    mean = jnp.mean(xm, axis=-1, keepdims=True)
    cen = xm - mean
    var = jnp.mean(cen * cen, axis=-1, keepdims=True)
    xhat = cen * jax.lax.rsqrt(var + LN_EPS)

    # Affine + projection folded into a single MXU matmul (+ bias add).
    y = jnp.dot(xhat.astype(w_ref.dtype), w_ref[...],
                preferred_element_type=jnp.float32)
    y = y + b_ref[...].astype(jnp.float32)
    o_ref[...] = y.astype(o_ref.dtype)


@functools.partial(jax.jit, static_argnames=("tb",))
def patch_merging_forward(x, gamma, beta, w_t, *, tb=None):
    """x: (B, H, W, C) -> (B, H//2, W//2, out_dim).

    gamma, beta: LayerNorm(4C) affine parameters, shape (4C,).
    w_t:         reduction weight transposed, shape (4C, out_dim), y = x @ w_t.
    """
    B, H, W, C = x.shape
    assert H % 2 == 0 and W % 2 == 0, f"x size ({H}*{W}) are not even."
    D = 4 * C
    out_dim = w_t.shape[1]
    Ho, Wo = H // 2, W // 2
    BHo = B * Ho

    # ---- parameter prep (tiny, once per call) -------------------------------
    # Kernel channel order [ (0,0), (0,1), (1,0), (1,1) ] vs PyTorch
    # [ (0,0), (1,0), (0,1), (1,1) ]  ->  permute weight/gamma rows.
    perm = jnp.concatenate([
        jnp.arange(0 * C, 1 * C), jnp.arange(2 * C, 3 * C),
        jnp.arange(1 * C, 2 * C), jnp.arange(3 * C, 4 * C)])
    w_eff = (gamma[:, None].astype(jnp.float32)
             * w_t.astype(jnp.float32))[perm, :]
    w_eff = w_eff.astype(w_t.dtype)          # keep bf16 weights in bf16
    bias = (beta.astype(jnp.float32) @ w_t.astype(jnp.float32)).reshape(1, out_dim)

    # Lane-dense output: pad out_dim up to a multiple of 128 (sliced off below).
    out_pad = ((out_dim + 127) // 128) * 128
    if out_pad != out_dim:
        w_eff = jnp.pad(w_eff, ((0, 0), (0, out_pad - out_dim)))
        bias = jnp.pad(bias, ((0, 0), (0, out_pad - out_dim)))

    # ---- free (bitcast-level) reshape: gather is NOT materialized in HBM ----
    # x_r[r, hoff, wo, woff*C + c] == x[b, 2*ho+hoff, 2*wo+woff, c], r = b*Ho+ho
    x_r = x.reshape(BHo, 2, Wo, 2 * C)

    # ---- row tiling ----------------------------------------------------------
    if tb is None:
        # ~512 merged rows per step; keep >= 2 grid steps for v7x's 2 TCs.
        tb = max(1, min(BHo, max(1, 512 // max(1, Wo))))
        if BHo >= 2:
            tb = min(tb, pl.cdiv(BHo, 2))
    grid = pl.cdiv(BHo, tb)   # partial last block handled by Pallas masking

    out2d = pl.pallas_call(
        _patch_merge_kernel,
        out_shape=jax.ShapeDtypeStruct((BHo * Wo, out_pad), x.dtype),
        grid_spec=pltpu.PrefetchScalarGridSpec(
            num_scalar_prefetch=0,
            grid=(grid,),
            in_specs=[
                pl.BlockSpec((tb, 2, Wo, 2 * C), lambda i: (i, 0, 0, 0)),
                # Constant index maps: Pallas DMAs weight/bias only once
                # (block index never changes across grid steps).
                pl.BlockSpec((D, out_pad), lambda i: (0, 0)),
                pl.BlockSpec((1, out_pad), lambda i: (0, 0)),
            ],
            out_specs=pl.BlockSpec((tb * Wo, out_pad), lambda i: (i, 0)),
        ),
        compiler_params=pltpu.CompilerParams(
            dimension_semantics=("parallel",),
            vmem_limit_bytes=64 * 1024 * 1024),
    )(x_r, w_eff, bias)

    return out2d[:, :out_dim].reshape(B, Ho, Wo, out_dim)


def reference_forward(x, gamma, beta, w_t):
    """Pure-JAX reference mirroring the PyTorch module."""
    x0 = x[:, 0::2, 0::2, :]
    x1 = x[:, 1::2, 0::2, :]
    x2 = x[:, 0::2, 1::2, :]
    x3 = x[:, 1::2, 1::2, :]
    xm = jnp.concatenate([x0, x1, x2, x3], axis=-1).astype(jnp.float32)
    mean = jnp.mean(xm, axis=-1, keepdims=True)
    var = jnp.mean((xm - mean) ** 2, axis=-1, keepdims=True)
    xn = (xm - mean) / jnp.sqrt(var + LN_EPS)
    xn = xn * gamma + beta
    return xn @ w_t.astype(jnp.float32)


if __name__ == "__main__":
    # Small, TPU-friendly shapes: B=2, H=W=16, C=64 -> 4C=256; out_dim=96 is
    # deliberately not a multiple of 128 to exercise the lane-padding path.
    B, H, W, C = 2, 16, 16, 64
    out_dim = 96

    key = jax.random.PRNGKey(0)
    kx, kw, kg, kb = jax.random.split(key, 4)

    x = jax.random.normal(kx, (B, H, W, C), dtype=jnp.float32)

    # nn.Linear(4C, out_dim, bias=False): weight (out_dim, 4C); nn.LayerNorm(4C).
    bound = 1.0 / (4 * C) ** 0.5
    w = jax.random.uniform(kw, (out_dim, 4 * C), minval=-bound, maxval=bound,
                           dtype=jnp.float32)
    w_t = w.T                                              # (4C, out_dim)
    # Non-trivial affine so the fold + channel permutation are actually tested.
    gamma = 1.0 + 0.1 * jax.random.normal(kg, (4 * C,), dtype=jnp.float32)
    beta = 0.1 * jax.random.normal(kb, (4 * C,), dtype=jnp.float32)

    out = patch_merging_forward(x, gamma, beta, w_t)
    jax.block_until_ready(out)

    ref = reference_forward(x, gamma, beta, w_t)
    assert out.shape == (B, H // 2, W // 2, out_dim), out.shape
    err = float(jnp.max(jnp.abs(out - ref)))
    assert jnp.allclose(out, ref, atol=1e-3, rtol=1e-3), err

    print("KERNEL_OK")
</pallas_src>

<mosaic_0001>
module attributes {stable_mosaic.version = 11 : i64} {
  func.func @_patch_merge_kernel(%arg0: i32, %arg1: memref<8x2x8x128xf32, #tpu.memory_space<vmem>>, %arg2: memref<256x128xf32, #tpu.memory_space<vmem>>, %arg3: memref<1x128xf32, #tpu.memory_space<vmem>>, %arg4: memref<64x128xf32, #tpu.memory_space<vmem>>) attributes {dimension_semantics = [#tpu.dimension_semantics<parallel>], iteration_bounds = array<i64: 2>, scalar_prefetch = 0 : i64, scratch_operands = 0 : i64, tpu.core_type = #tpu.core_type<tc>, window_params = [{transform_indices = @transform_0, window_bounds = array<i64: 8, 2, 8, 128>}, {pipeline_mode = #tpu.pipeline_mode<synchronous>, transform_indices = @transform_1, window_bounds = array<i64: 256, 128>}, {pipeline_mode = #tpu.pipeline_mode<synchronous>, transform_indices = @transform_2, window_bounds = array<i64: 1, 128>}, {transform_indices = @transform_3, window_bounds = array<i64: 64, 128>}]} {
    %c0 = arith.constant 0 : index
    %c0_0 = arith.constant 0 : index
    %c0_1 = arith.constant 0 : index
    %c0_2 = arith.constant 0 : index
    %0 = vector.load %arg1[%c0, %c0_0, %c0_1, %c0_2] : memref<8x2x8x128xf32, #tpu.memory_space<vmem>>, vector<8x2x8x128xf32>
    %1 = vector.extract_strided_slice %0 {offsets = [0, 0, 0, 0], sizes = [8, 1, 8, 128], strides = [1, 1, 1, 1]} : vector<8x2x8x128xf32> to vector<8x1x8x128xf32>
    %2 = vector.shape_cast %1 : vector<8x1x8x128xf32> to vector<8x8x128xf32>
    %3 = vector.extract_strided_slice %0 {offsets = [0, 1, 0, 0], sizes = [8, 1, 8, 128], strides = [1, 1, 1, 1]} : vector<8x2x8x128xf32> to vector<8x1x8x128xf32>
    %4 = vector.shape_cast %3 : vector<8x1x8x128xf32> to vector<8x8x128xf32>
    %5 = tpu.concatenate %2, %4 in 2 : vector<8x8x128xf32>, vector<8x8x128xf32> -> vector<8x8x256xf32>
    %6 = vector.shape_cast %5 : vector<8x8x256xf32> to vector<64x256xf32>
    %cst = arith.constant dense<0.000000e+00> : vector<64xf32>
    %7 = vector.multi_reduction <add>, %6, %cst [1] : vector<64x256xf32> to vector<64xf32>
    %8 = vector.shape_cast %7 : vector<64xf32> to vector<64x1xf32>
    %cst_3 = arith.constant 2.560000e+02 : f32
    %9 = vector.broadcast %cst_3 : f32 to vector<64x1xf32>
    %10 = arith.divf %8, %9 : vector<64x1xf32>
    %11 = vector.broadcast %10 : vector<64x1xf32> to vector<64x256xf32>
    %12 = arith.subf %6, %11 : vector<64x256xf32>
    %13 = arith.mulf %12, %12 : vector<64x256xf32>
    %cst_4 = arith.constant dense<0.000000e+00> : vector<64xf32>
    %14 = vector.multi_reduction <add>, %13, %cst_4 [1] : vector<64x256xf32> to vector<64xf32>
    %15 = vector.shape_cast %14 : vector<64xf32> to vector<64x1xf32>
    %cst_5 = arith.constant 2.560000e+02 : f32
    %16 = vector.broadcast %cst_5 : f32 to vector<64x1xf32>
    %17 = arith.divf %15, %16 : vector<64x1xf32>
    %cst_6 = arith.constant 9.99999974E-6 : f32
    %18 = vector.broadcast %cst_6 : f32 to vector<64x1xf32>
    %19 = arith.addf %17, %18 : vector<64x1xf32>
    %20 = math.rsqrt %19 : vector<64x1xf32>
    %21 = vector.broadcast %20 : vector<64x1xf32> to vector<64x256xf32>
    %22 = arith.mulf %12, %21 : vector<64x256xf32>
    %c0_7 = arith.constant 0 : index
    %c0_8 = arith.constant 0 : index
    %23 = vector.load %arg2[%c0_7, %c0_8] : memref<256x128xf32, #tpu.memory_space<vmem>>, vector<256x128xf32>
    %cst_9 = arith.constant dense<0.000000e+00> : vector<64x128xf32>
    %24 = tpu.matmul %22, %23, %cst_9 {dimension_numbers = #tpu.dot_dimension_numbers<[1], [0], [0], [1], [0, 0, 1, 1], [], []>} : vector<64x256xf32>, vector<256x128xf32>, vector<64x128xf32> -> vector<64x128xf32>
    %c0_10 = arith.constant 0 : index
    %c0_11 = arith.constant 0 : index
    %25 = vector.load %arg3[%c0_10, %c0_11] : memref<1x128xf32, #tpu.memory_space<vmem>>, vector<1x128xf32>
    %26 = vector.broadcast %25 : vector<1x128xf32> to vector<64x128xf32>
    %27 = arith.addf %24, %26 : vector<64x128xf32>
    %c0_12 = arith.constant 0 : index
    %c0_13 = arith.constant 0 : index
    %28 = vector.load %arg4[%c0_12, %c0_13] : memref<64x128xf32, #tpu.memory_space<vmem>>, vector<64x128xf32>
    tpu.vector_store %arg4[%c0_12, %c0_13], %27 {strides = array<i32>} : memref<64x128xf32, #tpu.memory_space<vmem>>, vector<64x128xf32>,
    return
  }
  func.func @transform_0(%arg0: i32) -> (i32, i32, i32, i32) {
    %c0_i32 = arith.constant 0 : i32
    %c0_i32_0 = arith.constant 0 : i32
    %c0_i32_1 = arith.constant 0 : i32
    %c0_i32_2 = arith.constant 0 : i32
    return %arg0, %c0_i32, %c0_i32_0, %c0_i32_1 : i32, i32, i32, i32
  }
  func.func @transform_1(%arg0: i32) -> (i32, i32) {
    %c0_i32 = arith.constant 0 : i32
    %c0_i32_0 = arith.constant 0 : i32
    %c0_i32_1 = arith.constant 0 : i32
    return %c0_i32, %c0_i32_0 : i32, i32
  }
  func.func @transform_2(%arg0: i32) -> (i32, i32) {
    %c0_i32 = arith.constant 0 : i32
    %c0_i32_0 = arith.constant 0 : i32
    %c0_i32_1 = arith.constant 0 : i32
    return %c0_i32, %c0_i32_0 : i32, i32
  }
  func.func @transform_3(%arg0: i32) -> (i32, i32) {
    %c0_i32 = arith.constant 0 : i32
    %c0_i32_0 = arith.constant 0 : i32
    return %arg0, %c0_i32 : i32, i32
  }
}

</mosaic_0001>

<bundles_post_ra>
// kernel: patch_merging_forward.1
= control target key start
LH: loop header
LB: loop body
LE: loop exit
PB: predicated region body
PF: predicated region fallthrough
CT: control target
= control target key end

     0   :  { %8 = vsyncpa [#allocation3], 0  ;;  %s1419_s0 = inlined_call_operand.hbm [shape: f32[16,2,8,128], index: 0, kind: input, shape index: {}]   ;;  %s1420_s1 = inlined_call_operand.hbm [shape: f32[256,128], index: 1, kind: input, shape index: {}]   ;;  %s1421_s2 = inlined_call_operand.hbm [shape: f32[1,128], index: 2, kind: input, shape index: {}]   ;;  %s1422_s3 = inlined_call_operand.hbm [shape: f32[128,128], index: 3, kind: output, shape index: {}]  }
   0x1   :  { %10 = vsyncpa [#allocation3 + $0x1], 0 }
   0x2   :  { %11 = vsyncpa [#allocation6], 0 }
   0x3   :  { %12 = vsyncpa [#allocation4], 0 }
   0x4   :  { %14 = vsyncpa [#allocation4 + $0x1], 0  ;;  %s1022_s12 = smov 0   ;;  %s1024_s13 = smov 0  }
   0x5   :  { %s1026_s14 = smov 0   ;;  %s1028_s15 = smov 0  }
   0x6 LB: > { %s1043_s16 = sadd.s32 4294967295, %s992_s15   ;;  %s622_s17 = sadd.s32 4294967294, %s992_s15   ;;  %s992_s15 = sphi %s1028_s15, %s1442_s15   ;;  %s988_s14 = sphi %s1026_s14, %s1441_s14   ;;  %s984_s13 = sphi %s1024_s13, %s1440_s13   ;;  %s980_s12 = sphi %s1022_s12, %s1439_s12  }
   0x7   : > { %p40_p0 = scmp.ne.s32.totalorder %s984_s13, %s980_s12  ;;  %p1423_p1 = scmp.eq.s32.totalorder %s1043_s16, 0 }
   0x8   : > { %p112_p3 = scmp.eq.s32.totalorder %s622_s17, 1  ;;  %p623_p5 = scmp.ge.s32.totalorder %s992_s15, 1 }
   0x9   : > { %p1052_p4 = por %p1423_p1, %p40_p0  ;;  %p119_p7 = scmp.lt.s32.totalorder %s992_s15, 3 }
   0xa   : > { %p1057_p6 = por %p112_p3, %p40_p0  ;;  %s994_s21 = smov [#allocation5]  }
   0xb   : > { %s1426_s18 = scalar_select %p1052_p4, 1, 0 }
   0xc   : > { %s1427_s19 = scalar_select %p1057_p6, 1, 0 }
   0xd   : > { %p1062_p8 = pnand %p623_p5, %p119_p7  ;;  %s131_s22 = sshll.u32 %s994_s21, 4  ;;  %s1066_s22 = int_to_ptr.vmem [resolvable:$true] %s131_s22 }
   0xe   : > { %s995_s24 = smov [#allocation7]   ;;  %s836_s28 = scalar_lea.hbm %s1420_s1, 4096 }
   0xf   : > { %p761_p9 = pneg %p1062_p8  ;;  %s145_s25 = sshll.u32 %s995_s24, 4  ;;  %s1077_s25 = int_to_ptr.vmem [resolvable:$true] %s145_s25 }
  0x10   : > { %p837_p12 = scmp.ne.s32.totalorder %s1420_s1, %s836_s28  ;;  %p843_p5 = scmp.lt.u32.totalorder %s836_s28, %s1420_s1 }
  0x11   : > { %p1073_p11 = pnand %p761_p9, %p1423_p1 }
  0x13   : > { %p838_p13 = pneg %p1073_p11 }
  0x15   : > { %p839_p0 = pnand %p838_p13, %p837_p12 }
  0x17   : > { %p840_p3 = pneg %p839_p0 }
  0x19   : > { %p845_p7 = pnand %p843_p5, %p840_p3 }
  0x1b   : > { %848 = shalt.err (!%p845_p7)
}
  0x1c   : > { %s849_s6 = scalar_lea.vmem %s1066_s22, 4096  ;;  %p857_p2 = scmp.lt.s32.totalorder %s1066_s22, %s1066_s22 }
  0x1d   : > { %p850_p9 = scmp.ne.s32.totalorder %s1066_s22, %s849_s6  ;;  %p858_p12 = scmp.lt.s32.totalorder %s849_s6, %s849_s6 }
  0x1f   : > { %p852_p10 = pnand %p850_p9, %p838_p13  ;;  %p859_p0 = por %p858_p12, %p857_p2 }
  0x21   : > { %p853_p1 = pneg %p852_p10 }
  0x23   : > { %p860_p6 = pnand %p859_p0, %p853_p1 }
  0x25   : > { %863 = shalt.err (!%p860_p6)
}
  0x26   : > { %s996_s7 = smov 128   ;;  %s997_s8 = smov 8  }
  0x27   : > { %764 = dma.hbm_to_vmem [thread:$0]  (!%p1073_p11), %s1420_s1, 4096, %s1066_s22, [#allocation6], %s996_s7, %s996_s7, %s997_s8  }
  0x28   : > { %s864_s21 = scalar_lea.hbm %s1421_s2, 16 }
  0x29   : > { %p865_p1 = scmp.ne.s32.totalorder %s1421_s2, %s864_s21  ;;  %p871_p10 = scmp.lt.u32.totalorder %s864_s21, %s1421_s2 }
  0x2b   : > { %p867_p2 = pnand %p865_p1, %p838_p13 }
  0x2d   : > { %p868_p6 = pneg %p867_p2 }
  0x2f   : > { %p873_p3 = pnand %p871_p10, %p868_p6 }
  0x31   : > { %876 = shalt.err (!%p873_p3)
}
  0x32   : > { %s877_s22 = scalar_lea.vmem %s1077_s25, 16  ;;  %s884_s29 = scalar_lea.vmem %s1077_s25, 32 }
  0x33   : > { %p878_p5 = scmp.ne.s32.totalorder %s1077_s25, %s877_s22  ;;  %p885_p12 = scmp.lt.s32.totalorder %s1077_s25, %s1077_s25 }
  0x34   : > { %p886_p0 = scmp.lt.s32.totalorder %s884_s29, %s877_s22 }
  0x35   : > { %p880_p7 = pnand %p878_p5, %p838_p13 }
  0x36   : > { %p887_p1 = por %p886_p0, %p885_p12 }
  0x37   : > { %p881_p9 = pneg %p880_p7 }
  0x39   : > { %p888_p2 = pnand %p887_p1, %p881_p9 }
  0x3b   : > { %891 = shalt.err (!%p888_p2)
}
  0x3c   : > { %767 = dma.hbm_to_vmem [thread:$0]  (!%p1073_p11), %s1421_s2, 16, %s1077_s25, [#allocation6]  }
  0x3d   : > { %s1136_s5 = sadd.s32 1, %s992_s15   ;;  %s27_s23 = sadd.s32 1, %s988_s14 }
  0x3e   : > { %s24_s6 = ssub.s32 %s992_s15, %s1136_s5  ;;  %p34_p13 = scmp.ne.s32.totalorder %s988_s14, %s984_s13 }
  0x3f   : > { %p25_p6 = scmp.eq.s32.totalorder %s24_s6, 0  ;;  %p35_p10 = scmp.eq.s32.totalorder %s992_s15, 0 }
  0x40   : > { %p1430_p3 = scmp.eq.s32.totalorder %s1043_s16, 1  ;;  %p778_p7 = scmp.lt.s32.totalorder %s992_s15, 2 }
  0x41   : > { %s1152_s10 = scalar_select %p25_p6, %s988_s14, %s27_s23  }
  0x42   : > { %p1146_p5 = por %p1430_p3, %p34_p13  ;;  %p36_p9 = por %p35_p10, %p34_p13 }
  0x43   : > { %s156_s11 = sand.u32 1, %s988_s14   ;;  %s643_s25 = sshll.u32 %s992_s15, 11 }
  0x44   : > { %s1431_s9 = scalar_select %p1146_p5, 1, 0 }
  0x45   : > { %s627_s17 = sshll.u32 %s156_s11, 7  ;;  %s1159_s26 = scalar_lea.hbm %s1419_s0, %s643_s25 }
  0x46   : > { %s160_s27 = scalar_lea.vmem [#allocation2], %s627_s17  ;;  %p1163_p11 = pnand %p778_p7, %p36_p9 }
  0x47   : > { %s168_s28 = sshll.u32 %s160_s27, 4  ;;  %s1167_s29 = scalar_lea.sflag [#allocation3], %s156_s11  ;;  %s1161_s28 = int_to_ptr.vmem [resolvable:$true] %s168_s28 }
  0x48   : > { %s892_s30 = scalar_lea.hbm %s1159_s26, 2048  ;;  %p894_p0 = pneg %p1163_p11 }
  0x49   : > { %p893_p12 = scmp.ne.s32.totalorder %s1159_s26, %s892_s30  ;;  %s897_s6 = scalar_lea.hbm %s1419_s0, 4096 }
  0x4a   : > { %p898_p13 = scmp.lt.u32.totalorder %s1159_s26, %s1419_s0  ;;  %p899_p6 = scmp.lt.u32.totalorder %s897_s6, %s892_s30 }
  0x4b   : > { %p895_p1 = pnand %p894_p0, %p893_p12  ;;  %p901_p3 = scmp.lt.u32.totalorder %s892_s30, %s1159_s26 }
  0x4c   : > { %p900_p10 = por %p899_p6, %p898_p13 }
  0x4d   : > { %p896_p2 = pneg %p895_p1 }
  0x4e   : > { %p902_p7 = por %p901_p3, %p900_p10 }
  0x50   : > { %p903_p9 = pnand %p902_p7, %p896_p2 }
  0x52   : > { %906 = shalt.err (!%p903_p9)
}
  0x53   : > { %s907_s11 = scalar_lea.vmem %s1161_s28, 2048  ;;  %s998_s21 = smov [#allocation2]  }
  0x54   : > { %p908_p12 = scmp.ne.s32.totalorder %s1161_s28, %s907_s11  ;;  %s912_s24 = sshll.u32 %s998_s21, 4  ;;  %s913_s24 = int_to_ptr.vmem [resolvable:$false] %s912_s24 }
  0x55   : > { %s914_s27 = scalar_lea.vmem %s913_s24, 4096  ;;  %p915_p4 = scmp.lt.s32.totalorder %s1161_s28, %s913_s24 }
  0x56   : > { %p910_p1 = pnand %p908_p12, %p894_p0  ;;  %p916_p13 = scmp.lt.s32.totalorder %s914_s27, %s907_s11 }
  0x58   : > { %p911_p5 = pneg %p910_p1  ;;  %p917_p6 = por %p916_p13, %p915_p4 }
  0x5a   : > { %p918_p10 = pnand %p917_p6, %p911_p5 }
  0x5c   : > { %921 = shalt.err (!%p918_p10)
}
  0x5d   : > { %771 = dma.hbm_to_vmem [thread:$0]  (!%p1163_p11), %s1159_s26, 2048, %s1161_s28, %s1167_s29, %s996_s7, %s996_s7, %s997_s8  }
  0x5e   : > { %180 = sbr.rel (%p1062_p8) target bundleno = 666 (0x29a), region = 32  ;;  %s1201_s30 = sand.u32 (!%p1062_p8), 1, %s984_s13  }
  0x5f   : > { %s632_s4 = sshll.u32 (!%p1062_p8), %s1201_s30, 7  ;;  %s183_s23 = scalar_lea.sflag (!%p1062_p8), [#allocation3], %s1201_s30 }
  0x60   : > { %s186_s6 = scalar_lea.vmem (!%p1062_p8), [#allocation2], %s632_s4  ;;  %p1433_p4 = scmp.ne.s32.totalorder (!%p1062_p8), %s1426_s18, 0 }
  0x65   : > { %967 = dma.done.wait (%p1433_p4), %s183_s23, 2048  }
  0x66   : > { %969 = vsyncadd (%p1433_p4), %s183_s23, 4294965248  ;;  %p1434_p5 = scmp.eq.s32.totalorder %s1043_s16, 0 }
  0x68   : > { %971 = dma.done.wait (%p1434_p5), [#allocation6], 4112   ;;  %p1435_p11 = pmov %p1434_p5 }
  0x69   : > { %v1213_v0 = vld [vmem:[%s186_s6] sm:$0xff]  ;;  %v1215_v1 = vld [vmem:[%s186_s6 + $0x8] sm:$0xff]  ;;  %v1217_v2 = vld [vmem:[%s186_s6 + $0x10] sm:$0xff]  ;;  %s635_s18 = sshll.u32 %s1201_s30, 6  ;;  %s644_s8 = sshll.u32 %s1043_s16, 10 }
  0x6a   : > { %973 = vsyncadd (%p1435_p11), [#allocation6], 4294963184  ;;  %v235_v3 = vadd.f32 %v1215_v1, %v1213_v0  ;;  %v1221_v4 = vld [vmem:[%s186_s6 + $0x18] sm:$0xff]  ;;  %v1223_v5 = vld [vmem:[%s186_s6 + $0x40] sm:$0xff]  ;;  %s1358_s20 = scalar_lea.vmem [#allocation8], %s635_s18  ;;  %s1374_s22 = scalar_lea.hbm %s1422_s3, %s644_s8 }
  0x6b   : > { %v1225_v6 = vld [vmem:[%s186_s6 + $0x48] sm:$0xff]  ;;  %v238_v7 = vadd.f32 %v1221_v4, %v1217_v2  ;;  %v1229_v8 = vld [vmem:[%s186_s6 + $0x50] sm:$0xff]  ;;  %v1231_v9 = vld [vmem:[%s186_s6 + $0x58] sm:$0xff]  ;;  %s530_s7 = sshll.u32 %s1358_s20, 4  ;;  %s517_s29 = scalar_lea.sflag [#allocation4], %s1201_s30  ;;  %s1367_s7 = int_to_ptr.vmem [resolvable:$true] %s530_s7 }
  0x6c   : > { %236 = vadd.xlane.f32.xlu0 %v235_v3  ;;  %v247_v10 = vadd.f32 %v1225_v6, %v1223_v5  ;;  %v250_v11 = vadd.f32 %v1231_v9, %v1229_v8  ;;  %v1237_v12 = vld [vmem:[%s186_s6 + $0x20] sm:$0xff]  ;;  %v1239_v13 = vld [vmem:[%s186_s6 + $0x28] sm:$0xff]  ;;  %v1249_v18 = vld [vmem:[%s186_s6 + $0x30] sm:$0xff]  ;;  %s922_s17 = scalar_lea.vmem %s1367_s7, 1024  ;;  %p1436_p0 = scmp.ne.s32.totalorder %s1431_s9, 0 }
  0x6d   : > { %239 = vadd.xlane.f32.xlu1 %v238_v7  ;;  %v1241_v14 = vld [vmem:[%s186_s6 + $0x60] sm:$0xff]  ;;  %v1243_v15 = vld [vmem:[%s186_s6 + $0x68] sm:$0xff]  ;;  %v241_v16 = vadd.f32 %v1239_v13, %v1237_v12  ;;  %v1251_v19 = vld [vmem:[%s186_s6 + $0x38] sm:$0xff]  ;;  %p923_p8 = scmp.ne.s32.totalorder %s1367_s7, %s922_s17  ;;  %s999_s16 = smov [#allocation8]  }
  0x6e   : > { %v253_v17 = vadd.f32 %v1243_v15, %v1241_v14  ;;  %v1253_v20 = vld [vmem:[%s186_s6 + $0x70] sm:$0xff]  ;;  %v1255_v21 = vld [vmem:[%s186_s6 + $0x78] sm:$0xff]  ;;  %v244_v22 = vadd.f32 %v1251_v19, %v1249_v18  ;;  %v380_v24 = vld [vmem:[#allocation5 + $0x80] sm:$0xff]  ;;  %s926_s25 = sshll.u32 %s999_s16, 4  ;;  %s927_s25 = int_to_ptr.vmem [resolvable:$false] %s926_s25 }
  0x6f   : > { %v256_v23 = vadd.f32 %v1255_v21, %v1253_v20  ;;  %v381_v25 = vld [vmem:[#allocation5 + $0x88] sm:$0xff]  ;;  %v364_v26 = vld [vmem:[#allocation5] sm:$0xff]  ;;  %v382_v29 = vld [vmem:[#allocation5 + $0x90] sm:$0xff]  ;;  %p924_p2 = pnand %p923_p8, %p1436_p0  ;;  %s928_s11 = scalar_lea.vmem %s927_s25, 2048 }
  0x70   : > { %248 = vadd.xlane.f32.xlu0 %v247_v10  ;;  %v701_v27 = vpack.c.bf16 %v381_v25, %v380_v24  ;;  %v365_v28 = vld [vmem:[#allocation5 + $0x8] sm:$0xff]  ;;  %v383_v30 = vld [vmem:[#allocation5 + $0x98] sm:$0xff]  ;;  %v366_v33 = vld [vmem:[#allocation5 + $0x10] sm:$0xff]  ;;  %p929_p7 = scmp.lt.s32.totalorder %s1367_s7, %s927_s25  ;;  %p930_p9 = scmp.lt.s32.totalorder %s928_s11, %s922_s17 }
  0x71   : > { %251 = vadd.xlane.f32.xlu1 %v250_v11  ;;  %v703_v31 = vpack.c.bf16 %v365_v28, %v364_v26  ;;  %v705_v32 = vpack.c.bf16 %v383_v30, %v382_v29  ;;  %v367_v34 = vld [vmem:[#allocation5 + $0x18] sm:$0xff]  ;;  %v384_v35 = vld [vmem:[#allocation5 + $0xa0] sm:$0xff]  ;;  %v385_v36 = vld [vmem:[#allocation5 + $0xa8] sm:$0xff]  ;;  %p925_p3 = pneg %p924_p2 }
  0x72   : > { %702 = vmatprep.subr.bf16.mxu0 %v701_v27  ;;  %733 = vmatprep.subr.bf16.mxu1 %v701_v27  ;;  %v707_v37 = vpack.c.bf16 %v367_v34, %v366_v33  ;;  %v709_v38 = vpack.c.bf16 %v385_v36, %v384_v35  ;;  %v368_v39 = vld [vmem:[#allocation5 + $0x20] sm:$0xff]  ;;  %v369_v40 = vld [vmem:[#allocation5 + $0x28] sm:$0xff]  ;;  %v386_v41 = vld [vmem:[#allocation5 + $0xb0] sm:$0xff]  ;;  %p931_p12 = por %p930_p9, %p929_p7 }
  0x73   : > { %704 = vmatpush3.bf16.msra.mxu0 %v703_v31  ;;  %741 = vmatpush3.bf16.msra.mxu1 %v703_v31  ;;  %v387_v42 = vld [vmem:[#allocation5 + $0xb8] sm:$0xff]  ;;  %v711_v43 = vpack.c.bf16 %v369_v40, %v368_v39  ;;  %v370_v45 = vld [vmem:[#allocation5 + $0x30] sm:$0xff]  ;;  %v388_v40 = vld [vmem:[#allocation5 + $0xc0] sm:$0xff] }
  0x74   : > { %242 = vadd.xlane.f32.xlu0 %v241_v16  ;;  %706 = vmatprep.subr.bf16.mxu0 %v705_v32  ;;  %v713_v44 = vpack.c.bf16 %v387_v42, %v386_v41  ;;  %v371_v46 = vld [vmem:[#allocation5 + $0x38] sm:$0xff]  ;;  %v389_v41 = vld [vmem:[#allocation5 + $0xc8] sm:$0xff]  ;;  %p932_p1 = pnand %p931_p12, %p925_p3 }
  0x75   : > { %254 = vadd.xlane.f32.xlu1 %v253_v17  ;;  %734 = vmatprep.subr.bf16.mxu1 %v705_v32  ;;  %v715_v47 = vpack.c.bf16 %v371_v46, %v370_v45  ;;  %v717_v42 = vpack.c.bf16 %v389_v41, %v388_v40  ;;  %v390_v46 = vld [vmem:[#allocation5 + $0xd0] sm:$0xff] }
  0x77   : > { %708 = vmatpush3.bf16.msra.mxu0 %v707_v37  ;;  %742 = vmatpush3.bf16.msra.mxu1 %v707_v37 }
  0x78   : > { %245 = vadd.xlane.f32.xlu0 %v244_v22  ;;  %710 = vmatprep.subr.bf16.mxu0 %v709_v38 }
  0x79   : > { %257 = vadd.xlane.f32.xlu1 %v256_v23  ;;  %735 = vmatprep.subr.bf16.mxu1 %v709_v38 }
  0x7b   : > { %712 = vmatpush3.bf16.msra.mxu0 %v711_v43  ;;  %743 = vmatpush3.bf16.msra.mxu1 %v711_v43  ;;  %v372_v43 = vld [vmem:[#allocation5 + $0x40] sm:$0xff] }
  0x7c   : > { %714 = vmatprep.subr.bf16.mxu0 %v713_v44  ;;  %736 = vmatprep.subr.bf16.mxu1 %v713_v44  ;;  %v373_v44 = vld [vmem:[#allocation5 + $0x48] sm:$0xff] }
  0x7d   : > { %v719_v45 = vpack.c.bf16 %v373_v44, %v372_v43 }
  0x7f   : > { %716 = vmatpush3.bf16.msra.mxu0 %v715_v47  ;;  %744 = vmatpush3.bf16.msra.mxu1 %v715_v47  ;;  %v391_v47 = vld [vmem:[#allocation5 + $0xd8] sm:$0xff] }
  0x80   : > { %718 = vmatprep.subr.bf16.mxu0 %v717_v42  ;;  %737 = vmatprep.subr.bf16.mxu1 %v717_v42 }
  0x83   : > { %720 = vmatpush3.bf16.msra.mxu0 %v719_v45  ;;  %745 = vmatpush3.bf16.msra.mxu1 %v719_v45 }
  0xf9   : > { %v237_v48 = vpop.xlane.xlu0 %236 }
  0xfa   : > { %v260_v49 = vmul.f32 0.00390625, %v237_v48  ;;  %v240_v50 = vpop.xlane.xlu1 %239  ;;  %v721_v48 = vpack.c.bf16 %v391_v47, %v390_v46 }
  0xfb   : > { %v261_v51 = vmul.f32 0.00390625, %v240_v50  ;;  %v375_v50 = vld [vmem:[#allocation5 + $0x58] sm:$0xff] }
  0xfc   : > { %v1262_v52 = vsub.f32 %v1213_v0, %v260_v49  ;;  %v1265_v53 = vsub.f32 %v1215_v1, %v260_v49  ;;  %v374_v49 = vld [vmem:[#allocation5 + $0x50] sm:$0xff]  ;;  %722 = vmatprep.subr.bf16.mxu0 %v721_v48  ;;  %738 = vmatprep.subr.bf16.mxu1 %v721_v48 }
  0xfd   : > { %v1268_v54 = vsub.f32 %v1217_v2, %v261_v51  ;;  %v1271_v55 = vsub.f32 %v1221_v4, %v261_v51  ;;  %v249_v56 = vpop.xlane.xlu0 %248  ;;  %v723_v51 = vpack.c.bf16 %v375_v50, %v374_v49 }
  0xfe   : > { %v264_v57 = vmul.f32 0.00390625, %v249_v56  ;;  %v252_v58 = vpop.xlane.xlu1 %251  ;;  %v284_v59 = vmul.f32 %v1262_v52, %v1262_v52  ;;  %v285_v60 = vmul.f32 %v1265_v53, %v1265_v53  ;;  %v392_v56 = vld [vmem:[#allocation5 + $0xe0] sm:$0xff] }
  0xff   : > { %v265_v61 = vmul.f32 0.00390625, %v252_v58  ;;  %v286_v62 = vmul.f32 %v1268_v54, %v1268_v54  ;;  %v287_v63 = vmul.f32 %v1271_v55, %v1271_v55  ;;  %724 = vmatpush3.bf16.msra.mxu0 %v723_v51  ;;  %746 = vmatpush3.bf16.msra.mxu1 %v723_v51 }
 0x100   : > { %v1282_v0 = vsub.f32 %v1223_v5, %v264_v57  ;;  %v1285_v1 = vsub.f32 %v1225_v6, %v264_v57  ;;  %v300_v2 = vadd.f32 %v285_v60, %v284_v59  ;;  %v393_v57 = vld [vmem:[#allocation5 + $0xe8] sm:$0xff]  ;;  %v376_v59 = vld [vmem:[#allocation5 + $0x60] sm:$0xff] }
 0x101   : > { %v1288_v3 = vsub.f32 %v1229_v8, %v265_v61  ;;  %v1291_v4 = vsub.f32 %v1231_v9, %v265_v61  ;;  %v243_v7 = vpop.xlane.xlu0 %242  ;;  %v303_v16 = vadd.f32 %v287_v63, %v286_v62  ;;  %v725_v58 = vpack.c.bf16 %v393_v57, %v392_v56  ;;  %v377_v60 = vld [vmem:[#allocation5 + $0x68] sm:$0xff]  ;;  %v394_v62 = vld [vmem:[#allocation5 + $0xf0] sm:$0xff]  ;;  %v395_v63 = vld [vmem:[#allocation5 + $0xf8] sm:$0xff] }
 0x102   : > { %v262_v10 = vmul.f32 0.00390625, %v243_v7  ;;  %301 = vadd.xlane.f32.xlu0 %v300_v2  ;;  %v255_v11 = vpop.xlane.xlu1 %254  ;;  %v292_v17 = vmul.f32 %v1282_v0, %v1282_v0  ;;  %v293_v5 = vmul.f32 %v1285_v1, %v1285_v1  ;;  %v727_v61 = vpack.c.bf16 %v377_v60, %v376_v59  ;;  %v378_v7 = vld [vmem:[#allocation5 + $0x70] sm:$0xff] }
 0x103   : > { %v266_v6 = vmul.f32 0.00390625, %v255_v11  ;;  %v294_v22 = vmul.f32 %v1288_v3, %v1288_v3  ;;  %v295_v8 = vmul.f32 %v1291_v4, %v1291_v4  ;;  %726 = vmatprep.subr.bf16.mxu0 %v725_v58  ;;  %739 = vmatprep.subr.bf16.mxu1 %v725_v58  ;;  %v729_v2 = vpack.c.bf16 %v395_v63, %v394_v62 }
 0x104   : > { %v1302_v9 = vsub.f32 %v1237_v12, %v262_v10  ;;  %v1305_v23 = vsub.f32 %v1239_v13, %v262_v10  ;;  %v312_v24 = vadd.f32 %v293_v5, %v292_v17  ;;  %728 = vmatpush3.bf16.msra.mxu0 %v727_v61  ;;  %747 = vmatpush3.bf16.msra.mxu1 %v727_v61  ;;  %v379_v10 = vld [vmem:[#allocation5 + $0x78] sm:$0xff] }
 0x105   : > { %v1308_v25 = vsub.f32 %v1241_v14, %v266_v6  ;;  %v1311_v26 = vsub.f32 %v1243_v15, %v266_v6  ;;  %v246_v27 = vpop.xlane.xlu0 %245  ;;  %v315_v30 = vadd.f32 %v295_v8, %v294_v22  ;;  %v731_v11 = vpack.c.bf16 %v379_v10, %v378_v7  ;;  %730 = vmatprep.subr.bf16.mxu0 %v729_v2 }
 0x106   : > { %v263_v28 = vmul.f32 0.00390625, %v246_v27  ;;  %304 = vadd.xlane.f32.xlu0 %v303_v16  ;;  %313 = vadd.xlane.f32.xlu1 %v312_v24  ;;  %v258_v29 = vpop.xlane.xlu1 %257  ;;  %v288_v12 = vmul.f32 %v1302_v9, %v1302_v9  ;;  %v289_v13 = vmul.f32 %v1305_v23, %v1305_v23 }
 0x107   : > { %v267_v31 = vmul.f32 0.00390625, %v258_v29  ;;  %v296_v14 = vmul.f32 %v1308_v25, %v1308_v25  ;;  %v297_v15 = vmul.f32 %v1311_v26, %v1311_v26  ;;  %740 = vmatprep.subr.bf16.mxu1 %v729_v2 }
 0x108   : > { %v1322_v32 = vsub.f32 %v1249_v18, %v263_v28  ;;  %v1325_v33 = vsub.f32 %v1251_v19, %v263_v28  ;;  %v306_v34 = vadd.f32 %v289_v13, %v288_v12  ;;  %732 = vmatpush3.bf16.msra.mxu0 %v731_v11  ;;  %748 = vmatpush3.bf16.msra.mxu1 %v731_v11 }
 0x109   : > { %v1328_v35 = vsub.f32 %v1253_v20, %v267_v31  ;;  %v1331_v36 = vsub.f32 %v1255_v21, %v267_v31  ;;  %v318_v37 = vadd.f32 %v297_v15, %v296_v14 }
 0x10a   : > { %316 = vadd.xlane.f32.xlu1 %v315_v30  ;;  %307 = vadd.xlane.f32.xlu0 %v306_v34  ;;  %v290_v38 = vmul.f32 %v1322_v32, %v1322_v32  ;;  %v291_v18 = vmul.f32 %v1325_v33, %v1325_v33 }
 0x10b   : > { %v298_v19 = vmul.f32 %v1328_v35, %v1328_v35  ;;  %v299_v39 = vmul.f32 %v1331_v36, %v1331_v36 }
 0x10c   : > { %v309_v20 = vadd.f32 %v291_v18, %v290_v38 }
 0x10d   : > { %v321_v21 = vadd.f32 %v299_v39, %v298_v19 }
 0x10e   : > { %319 = vadd.xlane.f32.xlu1 %v318_v37  ;;  %310 = vadd.xlane.f32.xlu0 %v309_v20 }
 0x112   : > { %322 = vadd.xlane.f32.xlu1 %v321_v21 }
 0x18f   : > { %v302_v16 = vpop.xlane.xlu0 %301 }
 0x190   : > { %v324_v17 = vmul.f32 0.00390625, %v302_v16 }
 0x192   : > { %v332_v5 = vadd.f32 1e-05, %v324_v17 }
 0x193   : > { %v314_v6 = vpop.xlane.xlu1 %313  ;;  %v305_v22 = vpop.xlane.xlu0 %304 }
 0x194   : > { %820 = vrsqrt.f32 %v332_v5  ;;  %v328_v8 = vmul.f32 0.00390625, %v314_v6  ;;  %v325_v24 = vmul.f32 0.00390625, %v305_v22 }
 0x196   : > { %v336_v27 = vadd.f32 1e-05, %v328_v8  ;;  %v333_v28 = vadd.f32 1e-05, %v325_v24 }
 0x197   : > { %v317_v29 = vpop.xlane.xlu1 %316  ;;  %v308_v30 = vpop.xlane.xlu0 %307 }
 0x198   : > { %822 = vrsqrt.f32 %v336_v27  ;;  %v329_v12 = vmul.f32 0.00390625, %v317_v29  ;;  %v326_v13 = vmul.f32 0.00390625, %v308_v30 }
 0x199   : > { %824 = vrsqrt.f32 %v333_v28 }
 0x19a   : > { %v337_v31 = vadd.f32 1e-05, %v329_v12  ;;  %v334_v14 = vadd.f32 1e-05, %v326_v13 }
 0x19b   : > { %v320_v15 = vpop.xlane.xlu1 %319  ;;  %v311_v34 = vpop.xlane.xlu0 %310 }
 0x19c   : > { %826 = vrsqrt.f32 %v337_v31  ;;  %v330_v37 = vmul.f32 0.00390625, %v320_v15  ;;  %v327_v38 = vmul.f32 0.00390625, %v311_v34 }
 0x19d   : > { %828 = vrsqrt.f32 %v334_v14 }
 0x19e   : > { %v821_v18 = vpop.eup %820  ;;  %v338_v19 = vadd.f32 1e-05, %v330_v37  ;;  %v335_v39 = vadd.f32 1e-05, %v327_v38 }
 0x19f   : > { %v323_v20 = vpop.xlane.xlu1 %322  ;;  %v349_v21 = vmul.f32 %v821_v18, %v1265_v53  ;;  %v348_v40 = vmul.f32 %v821_v18, %v1262_v52 }
 0x1a0   : > { %830 = vrsqrt.f32 %v338_v19  ;;  %v331_v41 = vmul.f32 0.00390625, %v323_v20 }
 0x1a1   : > { %832 = vrsqrt.f32 %v335_v39  ;;  %467 = vmatprep.mubr.f32.mxu0 %v349_v21 }
 0x1a2   : > { %v823_v42 = vpop.eup %822  ;;  %v339_v43 = vadd.f32 1e-05, %v331_v41  ;;  %468 = vmatmul.mubr.f32.vlgmr.msra.gmra.mrb[0].mxu0 %v348_v40 }
 0x1a3   : > { %v825_v44 = vpop.eup %824  ;;  %v357_v45 = vmul.f32 %v823_v42, %v1285_v1  ;;  %v356_v46 = vmul.f32 %v823_v42, %v1282_v0 }
 0x1a4   : > { %834 = vrsqrt.f32 %v339_v43  ;;  %v351_v47 = vmul.f32 %v825_v44, %v1271_v55  ;;  %v350_v48 = vmul.f32 %v825_v44, %v1268_v54 }
 0x1a5   : > { %487 = vmatprep.mubr.f32.mxu1 %v357_v45 }
 0x1a6   : > { %v827_v53 = vpop.eup %826  ;;  %472 = vmatprep.mubr.f32.mxu0 %v351_v47  ;;  %488 = vmatmul.mubr.f32.vlgmr.msra.gmra.mrb[0].mxu1 %v356_v46 }
 0x1a7   : > { %v829_v52 = vpop.eup %828  ;;  %473 = vmatmul.mubr.f32.gmra.mrb[2].mxu0 %v350_v48  ;;  %v359_v49 = vmul.f32 %v827_v53, %v1291_v4  ;;  %v358_v50 = vmul.f32 %v827_v53, %v1288_v3 }
 0x1a8   : > { %v353_v51 = vmul.f32 %v829_v52, %v1305_v23  ;;  %v352_v1 = vmul.f32 %v829_v52, %v1302_v9 }
 0x1a9   : > { %492 = vmatprep.mubr.f32.mxu1 %v359_v49 }
 0x1aa   : > { %v831_v0 = vpop.eup %830  ;;  %477 = vmatprep.mubr.f32.mxu0 %v353_v51  ;;  %493 = vmatmul.mubr.f32.gmra.mrb[2].mxu1 %v358_v50 }
 0x1ab   : > { %v833_v55 = vpop.eup %832  ;;  %478 = vmatmul.mubr.f32.gmra.mrb[4].mxu0 %v352_v1  ;;  %v361_v54 = vmul.f32 %v831_v0, %v1311_v26  ;;  %v360_v56 = vmul.f32 %v831_v0, %v1308_v25  ;;  %v636_v26 = vld [vmem:[#allocation7] ss:$0 sm:$0xff] }
 0x1ac   : > { %v355_v57 = vmul.f32 %v833_v55, %v1325_v33  ;;  %v354_v4 = vmul.f32 %v833_v55, %v1322_v32 }
 0x1ad   : > { %497 = vmatprep.mubr.f32.mxu1 %v361_v54 }
 0x1ae   : > { %v835_v3 = vpop.eup %834  ;;  %482 = vmatprep.mubr.f32.mxu0 %v355_v57  ;;  %498 = vmatmul.mubr.f32.gmra.mrb[4].mxu1 %v360_v56 }
 0x1af   : > { %483 = vmatmul.mubr.f32.gmra.mrb[6].mxu0 %v354_v4  ;;  %v363_v9 = vmul.f32 %v835_v3, %v1331_v36  ;;  %v362_v23 = vmul.f32 %v835_v3, %v1328_v35 }
 0x1b1   : > { %502 = vmatprep.mubr.f32.mxu1 %v363_v9 }
 0x1b2   : > { %503 = vmatmul.mubr.f32.gmra.mrb[6].mxu1 %v362_v23 }
 0x275   : > { %v677_v58 = vpop.f32.mrb[0].mxu0 }
 0x276   : > { %v678_v59 = vpop.f32.mrb[1].mxu0 }
 0x277   : > { %v679_v25 = vadd.f32 %v678_v59, %v677_v58 }
 0x279   : > { %v470_v60 = vadd.f32 %v679_v25, %v636_v26  ;;  %v689_v33 = vpop.f32.mrb[0].mxu1 }
 0x27a   : > { %v680_v61 = vpop.f32.mrb[2].mxu0  ;;  %v690_v32 = vpop.f32.mrb[1].mxu1 }
 0x27b   : > { %508 = vst [vmem:[%s1358_s20] sm:$0xff] %v470_v60  ;;  %v681_v36 = vpop.f32.mrb[3].mxu0  ;;  %v691_v62 = vadd.f32 %v690_v32, %v689_v33 }
 0x27c   : > { %v682_v35 = vadd.f32 %v681_v36, %v680_v61 }
 0x27d   : > { %v490_v63 = vadd.f32 %v691_v62, %v636_v26  ;;  %v692_v2 = vpop.f32.mrb[2].mxu1 }
 0x27e   : > { %v475_v7 = vadd.f32 %v682_v35, %v636_v26  ;;  %v683_v10 = vpop.f32.mrb[4].mxu0  ;;  %v693_v11 = vpop.f32.mrb[3].mxu1 }
 0x27f   : > { %512 = vst [vmem:[%s1358_s20 + $0x20] sm:$0xff] %v490_v63  ;;  %v684_v16 = vpop.f32.mrb[5].mxu0  ;;  %v694_v17 = vadd.f32 %v693_v11, %v692_v2 }
 0x280   : > { %509 = vst [vmem:[%s1358_s20 + $0x8] sm:$0xff] %v475_v7  ;;  %v685_v5 = vadd.f32 %v684_v16, %v683_v10 }
 0x281   : > { %v495_v6 = vadd.f32 %v694_v17, %v636_v26  ;;  %v695_v22 = vpop.f32.mrb[4].mxu1 }
 0x282   : > { %v480_v8 = vadd.f32 %v685_v5, %v636_v26  ;;  %v686_v24 = vpop.f32.mrb[6].mxu0  ;;  %v696_v27 = vpop.f32.mrb[5].mxu1 }
 0x283   : > { %513 = vst [vmem:[%s1358_s20 + $0x28] sm:$0xff] %v495_v6  ;;  %v687_v28 = vpop.f32.mrb[7].mxu0  ;;  %v697_v29 = vadd.f32 %v696_v27, %v695_v22 }
 0x284   : > { %510 = vst [vmem:[%s1358_s20 + $0x10] sm:$0xff] %v480_v8  ;;  %v688_v30 = vadd.f32 %v687_v28, %v686_v24 }
 0x285   : > { %v500_v12 = vadd.f32 %v697_v29, %v636_v26  ;;  %v698_v13 = vpop.f32.mrb[6].mxu1 }
 0x286   : > { %v485_v31 = vadd.f32 %v688_v30, %v636_v26  ;;  %v699_v14 = vpop.f32.mrb[7].mxu1 }
 0x287   : > { %514 = vst [vmem:[%s1358_s20 + $0x30] sm:$0xff] %v500_v12  ;;  %v700_v15 = vadd.f32 %v699_v14, %v698_v13 }
 0x288   : > { %511 = vst [vmem:[%s1358_s20 + $0x18] sm:$0xff] %v485_v31 }
 0x289   : > { %v505_v34 = vadd.f32 %v700_v15, %v636_v26 }
 0x28b   : > { %515 = vst [vmem:[%s1358_s20 + $0x38] sm:$0xff] %v505_v34 }
 0x28c   : > { %935 = shalt.err (!%p932_p1)
}
 0x28d   : > { %s936_s21 = scalar_lea.hbm %s1374_s22, 1024  ;;  %s940_s4 = scalar_lea.hbm %s1422_s3, 2048 }
 0x28e   : > { %p937_p13 = scmp.ne.s32.totalorder %s1374_s22, %s936_s21  ;;  %p941_p4 = scmp.lt.u32.totalorder %s1374_s22, %s1422_s3 }
 0x28f   : > { %p942_p5 = scmp.lt.u32.totalorder %s940_s4, %s936_s21  ;;  %p944_p8 = scmp.lt.u32.totalorder %s936_s21, %s1374_s22 }
 0x290   : > { %p938_p6 = pnand %p937_p13, %p1436_p0 }
 0x291   : > { %p943_p11 = por %p942_p5, %p941_p4 }
 0x292   : > { %p939_p10 = pneg %p938_p6 }
 0x293   : > { %p945_p2 = por %p944_p8, %p943_p11 }
 0x295   : > { %p946_p3 = pnand %p945_p2, %p939_p10 }
 0x297   : > { %949 = shalt.err (!%p946_p3)
}
 0x298   : > { %s1000_s18 = smov 128   ;;  %s1001_s20 = smov 8  }
 0x299   : > { %759 = dma.vmem_to_hbm [thread:$0]  (%p1436_p0), %s1367_s7, 1024, %s1374_s22, %s517_s29, %s1000_s18, %s1000_s18, %s1001_s20  }
 0x29a PF: > { %s545_s8 = sand.u32 1, %s980_s12   ;;  %p1437_p7 = scmp.ne.s32.totalorder %s1427_s19, 0 }
 0x29b   : > { %p1438_p9 = scmp.ge.s32.totalorder %s992_s15, 2  ;;  %s546_s26 = scalar_lea.sflag [#allocation4], %s545_s8 }
 0x29d   : > { %p773_p12 = pnand %p1438_p9, %p1437_p7 }
 0x29f   : > { %975 = dma.done.wait (!%p773_p12), %s546_s26, 1024  }
 0x2a0   : > { %977 = vsyncadd (!%p773_p12), %s546_s26, 4294966272  ;;  %p17_p1 = scmp.ge.s32.totalorder %s1136_s5, 4   ;;  %s1439_s12 = smov %s984_s13 }
 0x2a1   : > { %s1440_s13 = smov %s988_s14  ;;  %s1441_s14 = smov %s1152_s10 }
 0x2a2   : > { %s1442_s15 = smov %s1136_s5  ;;  %19 = sbr.rel (!%p17_p1) target bundleno = 6 (0x6), region = 85 }
 0x2a9   :  { %551 = vsyncpa [#allocation3], 1 }
 0x2aa   :  { %553 = vsyncpa [#allocation3 + $0x1], 1 }
 0x2ab   :  { %554 = vsyncpa [#allocation6], 1 }
 0x2ac   :  { %555 = vsyncpa [#allocation4], 1 }
 0x2ad   :  { %557 = vsyncpa [#allocation4 + $0x1], 1 }

</bundles_post_ra>
